<compile_context>
chip_gen: v7x
topology: tpu7x:2x2x1
jax: 0.10.0
libtpu: 0.0.40
codegen_flags: <defaults>
</compile_context>

<pallas_src>
import jax
import jax.numpy as jnp
from jax.experimental import pallas as pl
from jax.experimental.pallas import tpu as pltpu


def _round_up(v, m):
    return (v + m - 1) // m * m


def _matmul_kernel_single_k(x_ref, w_ref, o_ref):
    # K fits in one tile: no accumulator / init / finalize needed.
    o_ref[...] = jnp.dot(
        x_ref[...], w_ref[...], preferred_element_type=jnp.float32
    ).astype(o_ref.dtype)


def _matmul_kernel_multi_k(x_ref, w_ref, o_ref, acc_ref):
    # Accumulate over the K grid axis (last grid dim, "arbitrary").
    @pl.when(pl.program_id(2) == 0)
    def _():
        acc_ref[...] = jnp.zeros_like(acc_ref)

    acc_ref[...] += jnp.dot(
        x_ref[...], w_ref[...], preferred_element_type=jnp.float32
    )

    @pl.when(pl.program_id(2) == pl.num_programs(2) - 1)
    def _():
        o_ref[...] = acc_ref[...].astype(o_ref.dtype)


def synapse_forward(x, weight, *, tm=None, tn=None, tk=None,
                    cast_operands_to_bf16=False):
    """Pallas equivalent of Synapse.forward: returns x @ weight."""
    M, K = x.shape
    K2, N = weight.shape
    assert K == K2, "input_dim mismatch"

    out_dtype = x.dtype
    in_dtype = jnp.bfloat16 if cast_operands_to_bf16 else x.dtype
    xin = x.astype(in_dtype)
    win = weight.astype(in_dtype)
    in_bytes = jnp.dtype(in_dtype).itemsize
    out_bytes = jnp.dtype(out_dtype).itemsize

    # Tile caps: large enough to saturate the MXU (>=256-row LHS feed, lane-dense
    # >=512 output columns, long K tiles) yet small enough that double-buffered
    # tiles comfortably fit v7x's 64 MiB VMEM as well as v5e/v6e's 128 MiB.
    TM_CAP, TN_CAP, TK_CAP = 256, 512, 1024
    if tm is None:
        tm = min(_round_up(M, 8), TM_CAP)
    if tn is None:
        tn = min(_round_up(N, 128), TN_CAP)
    if tk is None:
        tk = min(_round_up(K, 128), TK_CAP)

    # Zero-pad so tiles divide evenly (zero padding over K is numerically exact).
    Mp, Np, Kp = _round_up(M, tm), _round_up(N, tn), _round_up(K, tk)
    if (Mp, Kp) != (M, K):
        xin = jnp.pad(xin, ((0, Mp - M), (0, Kp - K)))
    if (Kp, Np) != (K, N):
        win = jnp.pad(win, ((0, Kp - K), (0, Np - N)))

    gm, gn, gk = Mp // tm, Np // tn, Kp // tk

    cost = pl.CostEstimate(
        flops=2 * M * N * K,
        transcendentals=0,
        bytes_accessed=(M * K + K * N) * in_bytes + M * N * out_bytes,
    )
    vmem_need = (2 * (tm * tk + tk * tn) * in_bytes   # double-buffered input tiles
                 + tm * tn * 4                        # f32 accumulator scratch
                 + 2 * tm * tn * out_bytes)           # double-buffered output tile
    vmem_limit = int(min(max(vmem_need + (8 << 20), 32 << 20), 56 << 20))

    if gk == 1:
        # K fits in one tile: no reduction grid axis, no accumulator scratch.
        out_p = pl.pallas_call(
            _matmul_kernel_single_k,
            out_shape=jax.ShapeDtypeStruct((Mp, Np), out_dtype),
            grid_spec=pltpu.PrefetchScalarGridSpec(
                num_scalar_prefetch=0,
                grid=(gm, gn),
                in_specs=[
                    pl.BlockSpec((tm, Kp), lambda i, j: (i, 0)),
                    pl.BlockSpec((Kp, tn), lambda i, j: (0, j)),
                ],
                out_specs=pl.BlockSpec((tm, tn), lambda i, j: (i, j)),
            ),
            compiler_params=pltpu.CompilerParams(
                dimension_semantics=("parallel", "parallel"),
                vmem_limit_bytes=vmem_limit,
            ),
            cost_estimate=cost,
        )(xin, win)
    else:
        out_p = pl.pallas_call(
            _matmul_kernel_multi_k,
            out_shape=jax.ShapeDtypeStruct((Mp, Np), out_dtype),
            grid_spec=pltpu.PrefetchScalarGridSpec(
                num_scalar_prefetch=0,
                grid=(gm, gn, gk),
                in_specs=[
                    pl.BlockSpec((tm, tk), lambda i, j, k: (i, k)),
                    pl.BlockSpec((tk, tn), lambda i, j, k: (k, j)),
                ],
                out_specs=pl.BlockSpec((tm, tn), lambda i, j, k: (i, j)),
                scratch_shapes=[pltpu.VMEM((tm, tn), jnp.float32)],
            ),
            compiler_params=pltpu.CompilerParams(
                dimension_semantics=("parallel", "parallel", "arbitrary"),
                vmem_limit_bytes=vmem_limit,
            ),
            cost_estimate=cost,
        )(xin, win)

    if (Mp, Np) != (M, N):
        out_p = out_p[:M, :N]
    return out_p


if __name__ == "__main__":
    key = jax.random.PRNGKey(0)
    kx, kw, kx2, kw2 = jax.random.split(key, 4)

    # Primary test: matches nn.Parameter(torch.randn(input_dim, output_dim)).
    batch, input_dim, output_dim = 8, 128, 128
    x = jax.random.normal(kx, (batch, input_dim), dtype=jnp.float32)
    weight = jax.random.normal(kw, (input_dim, output_dim), dtype=jnp.float32)

    out = jax.block_until_ready(synapse_forward(x, weight))
    ref = jnp.matmul(x, weight, precision=jax.lax.Precision.HIGHEST)
    assert out.shape == (batch, output_dim)
    assert jnp.allclose(out, ref, atol=1e-3, rtol=1e-3)

    # Secondary test: exercise the K-accumulation (multi-K-tile) path at small size.
    M2, K2, N2 = 16, 256, 256
    x2 = jax.random.normal(kx2, (M2, K2), dtype=jnp.float32)
    w2 = jax.random.normal(kw2, (K2, N2), dtype=jnp.float32)
    out2 = jax.block_until_ready(synapse_forward(x2, w2, tk=128))
    ref2 = jnp.matmul(x2, w2, precision=jax.lax.Precision.HIGHEST)
    assert out2.shape == (M2, N2)
    assert jnp.allclose(out2, ref2, atol=1e-3, rtol=1e-3)

    # TODO(synk): update_weight (in-place plasticity step) is training-time state
    # mutation, not part of the forward pass; done in plain JAX if ever needed.
    print("KERNEL_OK")
</pallas_src>

<mosaic_0001>
module attributes {stable_mosaic.version = 11 : i64} {
  func.func @_matmul_kernel_single_k(%arg0: i32, %arg1: i32, %arg2: memref<8x128xf32, #tpu.memory_space<vmem>>, %arg3: memref<128x128xf32, #tpu.memory_space<vmem>>, %arg4: memref<8x128xf32, #tpu.memory_space<vmem>>) attributes {dimension_semantics = [#tpu.dimension_semantics<parallel>, #tpu.dimension_semantics<parallel>], iteration_bounds = array<i64: 1, 1>, scalar_prefetch = 0 : i64, scratch_operands = 0 : i64, tpu.core_type = #tpu.core_type<tc>, window_params = [{transform_indices = @transform_0, window_bounds = array<i64: 8, 128>}, {transform_indices = @transform_1, window_bounds = array<i64: 128, 128>}, {transform_indices = @transform_2, window_bounds = array<i64: 8, 128>}]} {
    %c0 = arith.constant 0 : index
    %c0_0 = arith.constant 0 : index
    %0 = vector.load %arg2[%c0, %c0_0] : memref<8x128xf32, #tpu.memory_space<vmem>>, vector<8x128xf32>
    %c0_1 = arith.constant 0 : index
    %c0_2 = arith.constant 0 : index
    %1 = vector.load %arg3[%c0_1, %c0_2] : memref<128x128xf32, #tpu.memory_space<vmem>>, vector<128x128xf32>
    %cst = arith.constant dense<0.000000e+00> : vector<8x128xf32>
    %2 = tpu.matmul %0, %1, %cst {dimension_numbers = #tpu.dot_dimension_numbers<[1], [0], [0], [1], [0, 0, 1, 1], [], []>} : vector<8x128xf32>, vector<128x128xf32>, vector<8x128xf32> -> vector<8x128xf32>
    %c0_3 = arith.constant 0 : index
    %c0_4 = arith.constant 0 : index
    %3 = vector.load %arg4[%c0_3, %c0_4] : memref<8x128xf32, #tpu.memory_space<vmem>>, vector<8x128xf32>
    tpu.vector_store %arg4[%c0_3, %c0_4], %2 {strides = array<i32>} : memref<8x128xf32, #tpu.memory_space<vmem>>, vector<8x128xf32>,
    return
  }
  func.func @transform_0(%arg0: i32, %arg1: i32) -> (i32, i32) {
    %c0_i32 = arith.constant 0 : i32
    %c0_i32_0 = arith.constant 0 : i32
    return %arg0, %c0_i32 : i32, i32
  }
  func.func @transform_1(%arg0: i32, %arg1: i32) -> (i32, i32) {
    %c0_i32 = arith.constant 0 : i32
    %c0_i32_0 = arith.constant 0 : i32
    return %c0_i32, %arg1 : i32, i32
  }
  func.func @transform_2(%arg0: i32, %arg1: i32) -> (i32, i32) {
    %c0_i32 = arith.constant 0 : i32
    return %arg0, %arg1 : i32, i32
  }
}

</mosaic_0001>

<bundles_post_ra>
// kernel: tpu_custom_call.1
= control target key start
LH: loop header
LB: loop body
LE: loop exit
PB: predicated region body
PF: predicated region fallthrough
CT: control target
= control target key end

     0   :  { %7 = vsyncpa [#allocation3], 0  ;;  %s364_s0 = inlined_call_operand.hbm [shape: f32[8,128], index: 0, kind: input, shape index: {}]   ;;  %s365_s1 = inlined_call_operand.hbm [shape: f32[128,128], index: 1, kind: input, shape index: {}]   ;;  %s366_s2 = inlined_call_operand.hbm [shape: f32[8,128], index: 2, kind: output, shape index: {}]  }
   0x1   :  { %8 = vsyncpa [#allocation6], 0 }
   0x2   :  { %9 = vsyncpa [#allocation4], 0  ;;  %s298_s9 = smov [#allocation2]   ;;  %s299_s11 = smov [#allocation5]  }
   0x3   :  { %s16_s10 = sshll.u32 %s298_s9, 4  ;;  %s25_s12 = sshll.u32 %s299_s11, 4  ;;  %s17_s10 = int_to_ptr.vmem [resolvable:$true] %s16_s10  ;;  %s321_s12 = int_to_ptr.vmem [resolvable:$true] %s25_s12 }
   0x4   :  { %s226_s15 = scalar_lea.hbm %s364_s0, 128 }
   0x5   :  { %p227_p0 = scmp.ne.s32.totalorder %s364_s0, %s226_s15  ;;  %p230_p1 = scmp.lt.u32.totalorder %s226_s15, %s364_s0 }
   0x7   :  { %p232_p2 = pnand %p230_p1, %p227_p0 }
   0x9   :  { %235 = shalt.err (!%p232_p2)
}
   0xa   :  { %s236_s20 = scalar_lea.vmem %s17_s10, 128  ;;  %p241_p4 = scmp.lt.s32.totalorder %s17_s10, %s17_s10 }
   0xb   :  { %p237_p3 = scmp.ne.s32.totalorder %s17_s10, %s236_s20  ;;  %p242_p5 = scmp.lt.s32.totalorder %s236_s20, %s236_s20 }
   0xd   :  { %p243_p6 = por %p242_p5, %p241_p4 }
   0xf   :  { %p244_p7 = pnand %p243_p6, %p237_p3 }
  0x11   :  { %247 = shalt.err (!%p244_p7)
}
  0x12   :  { %19 = dma.hbm_to_vmem [thread:$0]  %s364_s0, 128, %s17_s10, [#allocation3]  }
  0x13   :  { %s248_s25 = scalar_lea.hbm %s365_s1, 2048 }
  0x14   :  { %p249_p8 = scmp.ne.s32.totalorder %s365_s1, %s248_s25  ;;  %p252_p9 = scmp.lt.u32.totalorder %s248_s25, %s365_s1 }
  0x16   :  { %p254_p10 = pnand %p252_p9, %p249_p8 }
  0x18   :  { %257 = shalt.err (!%p254_p10)
}
  0x19   :  { %s258_s30 = scalar_lea.vmem %s321_s12, 2048  ;;  %p263_p12 = scmp.lt.s32.totalorder %s321_s12, %s321_s12 }
  0x1a   :  { %p259_p11 = scmp.ne.s32.totalorder %s321_s12, %s258_s30  ;;  %p264_p13 = scmp.lt.s32.totalorder %s258_s30, %s258_s30 }
  0x1c   :  { %p265_p0 = por %p264_p13, %p263_p12 }
  0x1e   :  { %p266_p1 = pnand %p265_p0, %p259_p11 }
  0x20   :  { %269 = shalt.err (!%p266_p1)
}
  0x21   :  { %s300_s0 = smov 128   ;;  %s301_s3 = smov 8  }
  0x22   :  { %31 = dma.hbm_to_vmem [thread:$0]  %s365_s1, 2048, %s321_s12, [#allocation6], %s300_s0, %s300_s0, %s301_s3  }
  0x23   :  { %292 = dma.done.wait [#allocation3], 128  }
  0x24   :  { %293 = vsyncadd [#allocation3], 4294967168 }
  0x25   :  { %294 = dma.done.wait [#allocation6], 2048  }
  0x26   :  { %295 = vsyncadd [#allocation6], 4294965248  ;;  %v302_v0 = vmov 0.0|0.0   ;;  %vm303_vm0 = vmmov 0   ;;  %v304_v1 = vmov 0.0   ;;  %v39_v2 = vld [vmem:[#allocation5] sm:$0xff] }
  0x27   :  { %194 = vmatprep.subr.bf16.mxu0 %v302_v0  ;;  %191 = vmatprep.mubr.msk.f32.mxu0 %vm303_vm0, %v304_v1  ;;  %v40_v3 = vld [vmem:[#allocation5 + $0x8] sm:$0xff]  ;;  %v41_v4 = vld [vmem:[#allocation5 + $0x10] sm:$0xff]  ;;  %v42_v6 = vld [vmem:[#allocation5 + $0x18] sm:$0xff]  ;;  %s305_s1 = smov [#allocation7]  }
  0x28   :  { %v195_v5 = vpack.c.bf16 %v40_v3, %v39_v2  ;;  %v198_v7 = vpack.c.bf16 %v42_v6, %v41_v4  ;;  %v43_v8 = vld [vmem:[#allocation5 + $0x20] sm:$0xff]  ;;  %v44_v9 = vld [vmem:[#allocation5 + $0x28] sm:$0xff]  ;;  %v45_v11 = vld [vmem:[#allocation5 + $0x30] sm:$0xff]  ;;  %s132_s6 = sshll.u32 %s305_s1, 4  ;;  %s133_s6 = int_to_ptr.vmem [resolvable:$true] %s132_s6 }
  0x29   :  { %v201_v10 = vpack.c.bf16 %v44_v9, %v43_v8  ;;  %v46_v12 = vld [vmem:[#allocation5 + $0x38] sm:$0xff]  ;;  %v47_v14 = vld [vmem:[#allocation5 + $0x40] sm:$0xff]  ;;  %v48_v15 = vld [vmem:[#allocation5 + $0x48] sm:$0xff]  ;;  %s270_s7 = scalar_lea.vmem %s133_s6, 128  ;;  %p275_p3 = scmp.lt.s32.totalorder %s133_s6, %s133_s6 }
  0x2a   :  { %196 = vmatpush3.bf16.msra.mxu0 %v195_v5  ;;  %v204_v13 = vpack.c.bf16 %v46_v12, %v45_v11  ;;  %v207_v16 = vpack.c.bf16 %v48_v15, %v47_v14  ;;  %v49_v17 = vld [vmem:[#allocation5 + $0x50] sm:$0xff]  ;;  %v50_v18 = vld [vmem:[#allocation5 + $0x58] sm:$0xff]  ;;  %v51_v20 = vld [vmem:[#allocation5 + $0x60] sm:$0xff]  ;;  %p271_p2 = scmp.ne.s32.totalorder %s133_s6, %s270_s7  ;;  %p276_p4 = scmp.lt.s32.totalorder %s270_s7, %s270_s7 }
  0x2b   :  { %197 = vmatprep.subr.bf16.mxu0 %v302_v0  ;;  %v210_v19 = vpack.c.bf16 %v50_v18, %v49_v17  ;;  %v52_v21 = vld [vmem:[#allocation5 + $0x68] sm:$0xff]  ;;  %v53_v23 = vld [vmem:[#allocation5 + $0x70] sm:$0xff]  ;;  %v54_v24 = vld [vmem:[#allocation5 + $0x78] sm:$0xff] }
  0x2c   :  { %v213_v22 = vpack.c.bf16 %v52_v21, %v51_v20  ;;  %v216_v25 = vpack.c.bf16 %v54_v24, %v53_v23  ;;  %v38_v26 = vld [vmem:[#allocation2] sm:$0xff]  ;;  %p277_p5 = por %p276_p4, %p275_p3 }
  0x2e   :  { %199 = vmatpush3.bf16.msra.mxu0 %v198_v7  ;;  %p278_p6 = pnand %p277_p5, %p271_p2 }
  0x2f   :  { %200 = vmatprep.subr.bf16.mxu0 %v302_v0 }
  0x32   :  { %202 = vmatpush3.bf16.msra.mxu0 %v201_v10 }
  0x33   :  { %203 = vmatprep.subr.bf16.mxu0 %v302_v0 }
  0x36   :  { %205 = vmatpush3.bf16.msra.mxu0 %v204_v13 }
  0x37   :  { %206 = vmatprep.subr.bf16.mxu0 %v302_v0 }
  0x3a   :  { %208 = vmatpush3.bf16.msra.mxu0 %v207_v16 }
  0x3b   :  { %209 = vmatprep.subr.bf16.mxu0 %v302_v0 }
  0x3e   :  { %211 = vmatpush3.bf16.msra.mxu0 %v210_v19 }
  0x3f   :  { %212 = vmatprep.subr.bf16.mxu0 %v302_v0 }
  0x42   :  { %214 = vmatpush3.bf16.msra.mxu0 %v213_v22 }
  0x43   :  { %215 = vmatprep.subr.bf16.mxu0 %v302_v0 }
  0x46   :  { %217 = vmatpush3.bf16.msra.mxu0 %v216_v25 }
  0x49   :  { %192 = vmatmul.mubr.f32.vlgmr.msra.gmra.mrb[0].mxu0 %v38_v26 }
 0x11c   :  { %v121_v27 = vpop.f32.mrb[0].mxu0 }
 0x11d   :  { %125 = vst [vmem:[#allocation7] sm:$0xff] %v121_v27  ;;  %v193_v28 = vpop.f32.mrb[1].mxu0 }
 0x11e   :  { %281 = shalt.err (!%p278_p6)
}
 0x11f   :  { %s282_s10 = scalar_lea.hbm %s366_s2, 128 }
 0x120   :  { %p283_p7 = scmp.ne.s32.totalorder %s366_s2, %s282_s10  ;;  %p286_p8 = scmp.lt.u32.totalorder %s282_s10, %s366_s2 }
 0x122   :  { %p288_p9 = pnand %p286_p8, %p283_p7 }
 0x124   :  { %291 = shalt.err (!%p288_p9)
}
 0x125   :  { %135 = dma.vmem_to_hbm [thread:$0]  %s133_s6, 128, %s366_s2, [#allocation4]  }
 0x126   :  { %296 = dma.done.wait [#allocation4], 128  }
 0x127   :  { %297 = vsyncadd [#allocation4], 4294967168 }
 0x128   :  { %139 = vsyncpa [#allocation3], 1 }
 0x129   :  { %140 = vsyncpa [#allocation6], 1 }
 0x12a   :  { %141 = vsyncpa [#allocation4], 1 }

</bundles_post_ra>
